<compile_context>
chip_gen: v5e
topology: v5e:2x2
jax: 0.10.0
libtpu: 0.0.40
codegen_flags: <defaults>
</compile_context>

<pallas_src>
import jax
import jax.numpy as jnp
import numpy as np
from jax import lax
from jax.experimental import pallas as pl
from jax.experimental.pallas import tpu as pltpu

EPS = 1e-5
HW = 14 * 14  # 196 output pixels per patch


def _local_feature_kernel(taps_ref, dw_ref, b1_ref, pw_ref, b2_ref, out_ref):
    """One batch tile, all 4 patches packed on the sublane axis.

    Shapes inside the kernel:
      taps_ref : (bn, 9*4*Cin, 196)  rows ordered (tap, patch, channel), HW on lanes
      dw_ref   : (9, 4*Cin, 1)       depthwise 3x3 weights with BN1 scale folded in
      b1_ref   : (4*Cin, 1)          folded BN1 bias
      pw_ref   : (4, Cin, Cout, 1)   1x1 weights with BN2 scale folded in
      b2_ref   : (4*Cout, 1)         folded BN2 bias
      out_ref  : (bn, 4*Cout, 196)   rows ordered (patch, out-channel)
    """
    n_patch, cin, cout, _ = pw_ref.shape
    g = n_patch * cin                      # rows per tap group (16 -> 8-aligned slices)

    dw = dw_ref[...]                       # (9, 4*Cin, 1)
    b1 = b1_ref[...]                       # (4*Cin, 1)
    pw = pw_ref[...]                       # (4, Cin, Cout, 1)
    b2 = b2_ref[...]                       # (4*Cout, 1)

    # Depthwise 3x3 stride-2 conv == 9 sublane-dense broadcast FMAs (VPU).
    acc = taps_ref[:, 0:g, :] * dw[0]                            # (bn, 4*Cin, 196)
    for t in range(1, 9):
        acc = acc + taps_ref[:, t * g:(t + 1) * g, :] * dw[t]

    # Folded-BN1 bias + ReLU.
    h = jnp.maximum(acc + b1, 0.0)                               # (bn, 4*Cin, 196)

    # Pointwise 1x1 conv per patch: Cin broadcast FMAs (VPU; MXU deliberately unused).
    for p in range(n_patch):
        zp = h[:, p * cin:p * cin + 1, :] * pw[p, 0]             # (bn, Cout, 196)
        for c in range(1, cin):
            zp = zp + h[:, p * cin + c:p * cin + c + 1, :] * pw[p, c]
        out_ref[:, p * cout:(p + 1) * cout, :] = jnp.maximum(
            zp + b2[p * cout:(p + 1) * cout], 0.0).astype(out_ref.dtype)


def _extract_taps(x):
    """XLA glue: slice 4 patches, pad, extract the 9 stride-2 conv taps, packed layout.

    Output: (N, 9*4*Cin, 196), rows ordered (tap, patch, channel) so every 16-row tap
    group slices at an 8-aligned sublane offset inside the kernel.  HW stays the minor
    dim the whole way (lane-dense copies); a single concatenate produces the final
    layout (no second relayout pass).
    """
    n, cin = x.shape[0], x.shape[1]
    patches = [
        x[:, :, 0:28, 0:28],    # patch_11
        x[:, :, 28:56, 0:28],   # patch_21
        x[:, :, 0:28, 28:56],   # patch_12
        x[:, :, 28:56, 28:56],  # patch_22
    ]
    padded = [jnp.pad(p, ((0, 0), (0, 0), (1, 1), (1, 1))) for p in patches]  # (N,Cin,30,30)
    rows = []
    for ki in range(3):
        for kj in range(3):
            for pp in padded:
                rows.append(pp[:, :, ki:ki + 28:2, kj:kj + 28:2].reshape(n, cin, HW))
    return jnp.concatenate(rows, axis=1)   # (N, 9*4*Cin, 196)


def local_feature_extractor(x, params, max_batch_block=32):
    """x: (N, Cin, 56, 56) float32 NCHW.  Returns (N, Cout, 28, 28) float32 NCHW."""
    N, Cin = x.shape[0], x.shape[1]
    Cout = params["pw_w"].shape[1]
    n_rows = 9 * 4 * Cin

    taps = _extract_taps(x.astype(jnp.float32))                   # (N, 144, 196)

    # Parameter setup (glue): fold eval-mode BN scale into the conv weights.
    s1 = params["g1"] / jnp.sqrt(params["v1"] + EPS)              # (4, Cin)
    b1 = params["b1"] - params["m1"] * s1                         # (4, Cin)
    s2 = params["g2"] / jnp.sqrt(params["v2"] + EPS)              # (4, Cout)
    b2 = params["b2"] - params["m2"] * s2                         # (4, Cout)

    # dw_w: (4, Cin, 3, 3) -> (tap, patch, chan) rows matching the taps packing.
    dw = jnp.transpose(params["dw_w"], (2, 3, 0, 1)).reshape(9, 4, Cin)
    dw_k = (dw * s1[None]).reshape(9, 4 * Cin, 1)                 # (9, 4*Cin, 1)
    b1_k = b1.reshape(4 * Cin, 1)                                 # (4*Cin, 1), rows (p, c)
    # pw_w: (4, Cout, Cin) -> (patch, cin, cout) with BN2 scale folded in.
    pw_k = (jnp.transpose(params["pw_w"], (0, 2, 1)) * s2[:, None, :])[..., None]  # (4,Cin,Cout,1)
    b2_k = b2.reshape(4 * Cout, 1)                                # (4*Cout, 1), rows (p, o)

    # Batch tile: one grid step at small N; capped so the taps block (+double buffer)
    # stays ~12 MiB, safely inside every chip's VMEM (v7x physical is only 64 MiB).
    bn = min(N, max_batch_block)
    n_pad = (-N) % bn
    if n_pad:
        taps = jnp.pad(taps, ((0, n_pad), (0, 0), (0, 0)))
    Np = N + n_pad

    out_flat = pl.pallas_call(
        _local_feature_kernel,
        out_shape=jax.ShapeDtypeStruct((Np, 4 * Cout, HW), jnp.float32),
        grid=(Np // bn,),
        in_specs=[
            pl.BlockSpec((bn, n_rows, HW), lambda b: (b, 0, 0)),
            # Tiny weights/biases: constant index_map -> DMA'd once, grid-resident.
            pl.BlockSpec((9, 4 * Cin, 1), lambda b: (0, 0, 0)),
            pl.BlockSpec((4 * Cin, 1), lambda b: (0, 0)),
            pl.BlockSpec((4, Cin, Cout, 1), lambda b: (0, 0, 0, 0)),
            pl.BlockSpec((4 * Cout, 1), lambda b: (0, 0)),
        ],
        out_specs=pl.BlockSpec((bn, 4 * Cout, HW), lambda b: (b, 0, 0)),
        compiler_params=pltpu.CompilerParams(
            dimension_semantics=("parallel",),
            vmem_limit_bytes=32 * 1024 * 1024),
    )(taps, dw_k, b1_k, pw_k, b2_k)

    out_flat = out_flat[:N]                                       # (N, 4*Cout, 196)

    # Glue: single reshape + transpose replaces the three torch.cat copies.
    # kernel rows are p*Cout + o with patch p = 2*wb + hb; lanes are h*14 + w.
    out6 = out_flat.reshape(N, 2, 2, Cout, 14, 14)                # (n, wb, hb, o, h, w)
    return jnp.transpose(out6, (0, 3, 2, 4, 1, 5)).reshape(N, Cout, 28, 28)


def _bn(y, g, b, m, v):
    return (y - m[None, :, None, None]) / jnp.sqrt(v[None, :, None, None] + EPS) \
        * g[None, :, None, None] + b[None, :, None, None]


def reference_forward(x, params):
    """Pure-JAX reference (lax conv) mirroring the PyTorch forward, eval-mode BN."""
    Cin = x.shape[1]
    slices = [(slice(0, 28), slice(0, 28)), (slice(28, 56), slice(0, 28)),
              (slice(0, 28), slice(28, 56)), (slice(28, 56), slice(28, 56))]
    outs = []
    for p, (hs, ws) in enumerate(slices):
        patch = x[:, :, hs, ws]
        dw = params["dw_w"][p].reshape(Cin, 1, 3, 3)
        y = lax.conv_general_dilated(
            patch, dw, window_strides=(2, 2), padding=((1, 1), (1, 1)),
            dimension_numbers=("NCHW", "OIHW", "NCHW"), feature_group_count=Cin)
        y = jnp.maximum(_bn(y, params["g1"][p], params["b1"][p],
                            params["m1"][p], params["v1"][p]), 0.0)
        z = jnp.einsum("nchw,oc->nohw", y, params["pw_w"][p])
        z = jnp.maximum(_bn(z, params["g2"][p], params["b2"][p],
                            params["m2"][p], params["v2"][p]), 0.0)
        outs.append(z)
    top = jnp.concatenate([outs[0], outs[1]], axis=2)
    bot = jnp.concatenate([outs[2], outs[3]], axis=2)
    return jnp.concatenate([top, bot], axis=3)


def make_params(key, cin, cout):
    ks = jax.random.split(key, 12)
    return {
        "dw_w": jax.random.normal(ks[0], (4, cin, 3, 3), jnp.float32) * 0.2,
        "pw_w": jax.random.normal(ks[1], (4, cout, cin), jnp.float32) * 0.2,
        "g1": jax.random.uniform(ks[2], (4, cin), jnp.float32, 0.5, 1.5),
        "b1": jax.random.normal(ks[3], (4, cin), jnp.float32) * 0.1,
        "m1": jax.random.normal(ks[4], (4, cin), jnp.float32) * 0.1,
        "v1": jax.random.uniform(ks[5], (4, cin), jnp.float32, 0.5, 1.5),
        "g2": jax.random.uniform(ks[6], (4, cout), jnp.float32, 0.5, 1.5),
        "b2": jax.random.normal(ks[7], (4, cout), jnp.float32) * 0.1,
        "m2": jax.random.normal(ks[8], (4, cout), jnp.float32) * 0.1,
        "v2": jax.random.uniform(ks[9], (4, cout), jnp.float32, 0.5, 1.5),
    }


if __name__ == "__main__":
    N, Cin, Cout = 2, 4, 8
    key = jax.random.PRNGKey(0)
    kx, kp = jax.random.split(key)
    x = jax.random.normal(kx, (N, Cin, 56, 56), jnp.float32)   # NCHW, H=W=56 (4x 28x28 patches)
    params = make_params(kp, Cin, Cout)

    out = jax.block_until_ready(local_feature_extractor(x, params))
    ref = jax.block_until_ready(reference_forward(x, params))

    assert out.shape == (N, Cout, 28, 28), out.shape
    np.testing.assert_allclose(np.asarray(out), np.asarray(ref), atol=1e-4, rtol=1e-4)
    print("KERNEL_OK")
</pallas_src>

<mosaic_0001>
module attributes {stable_mosaic.version = 11 : i64} {
  func.func @_local_feature_kernel(%arg0: i32, %arg1: memref<2x144x196xf32, #tpu.memory_space<vmem>>, %arg2: memref<9x16x1xf32, #tpu.memory_space<vmem>>, %arg3: memref<16x1xf32, #tpu.memory_space<vmem>>, %arg4: memref<4x4x8x1xf32, #tpu.memory_space<vmem>>, %arg5: memref<32x1xf32, #tpu.memory_space<vmem>>, %arg6: memref<2x32x196xf32, #tpu.memory_space<vmem>>) attributes {dimension_semantics = [#tpu.dimension_semantics<parallel>], iteration_bounds = array<i64: 1>, scalar_prefetch = 0 : i64, scratch_operands = 0 : i64, tpu.core_type = #tpu.core_type<tc>, window_params = [{transform_indices = @transform_0, window_bounds = array<i64: 2, 144, 196>}, {pipeline_mode = #tpu.pipeline_mode<synchronous>, transform_indices = @transform_1, window_bounds = array<i64: 9, 16, 1>}, {pipeline_mode = #tpu.pipeline_mode<synchronous>, transform_indices = @transform_2, window_bounds = array<i64: 16, 1>}, {pipeline_mode = #tpu.pipeline_mode<synchronous>, transform_indices = @transform_3, window_bounds = array<i64: 4, 4, 8, 1>}, {pipeline_mode = #tpu.pipeline_mode<synchronous>, transform_indices = @transform_4, window_bounds = array<i64: 32, 1>}, {transform_indices = @transform_5, window_bounds = array<i64: 2, 32, 196>}]} {
    %c0 = arith.constant 0 : index
    %c0_0 = arith.constant 0 : index
    %c0_1 = arith.constant 0 : index
    %0 = vector.load %arg2[%c0, %c0_0, %c0_1] : memref<9x16x1xf32, #tpu.memory_space<vmem>>, vector<9x16x1xf32>
    %c0_2 = arith.constant 0 : index
    %c0_3 = arith.constant 0 : index
    %1 = vector.load %arg3[%c0_2, %c0_3] : memref<16x1xf32, #tpu.memory_space<vmem>>, vector<16x1xf32>
    %c0_4 = arith.constant 0 : index
    %c0_5 = arith.constant 0 : index
    %c0_6 = arith.constant 0 : index
    %c0_7 = arith.constant 0 : index
    %2 = vector.load %arg4[%c0_4, %c0_5, %c0_6, %c0_7] : memref<4x4x8x1xf32, #tpu.memory_space<vmem>>, vector<4x4x8x1xf32>
    %c0_8 = arith.constant 0 : index
    %c0_9 = arith.constant 0 : index
    %3 = vector.load %arg5[%c0_8, %c0_9] : memref<32x1xf32, #tpu.memory_space<vmem>>, vector<32x1xf32>
    %c0_10 = arith.constant 0 : index
    %c0_11 = arith.constant 0 : index
    %c0_12 = arith.constant 0 : index
    %4 = vector.load %arg1[%c0_10, %c0_11, %c0_12] : memref<2x144x196xf32, #tpu.memory_space<vmem>>, vector<2x16x196xf32>
    %5 = vector.extract_strided_slice %0 {offsets = [0, 0, 0], sizes = [1, 16, 1], strides = [1, 1, 1]} : vector<9x16x1xf32> to vector<1x16x1xf32>
    %6 = vector.shape_cast %5 : vector<1x16x1xf32> to vector<16x1xf32>
    %7 = vector.shape_cast %6 : vector<16x1xf32> to vector<1x16x1xf32>
    %8 = vector.broadcast %7 : vector<1x16x1xf32> to vector<2x16x196xf32>
    %9 = arith.mulf %4, %8 : vector<2x16x196xf32>
    %c0_13 = arith.constant 0 : index
    %c16 = arith.constant 16 : index
    %c0_14 = arith.constant 0 : index
    %10 = vector.load %arg1[%c0_13, %c16, %c0_14] : memref<2x144x196xf32, #tpu.memory_space<vmem>>, vector<2x16x196xf32>
    %11 = vector.extract_strided_slice %0 {offsets = [1, 0, 0], sizes = [1, 16, 1], strides = [1, 1, 1]} : vector<9x16x1xf32> to vector<1x16x1xf32>
    %12 = vector.shape_cast %11 : vector<1x16x1xf32> to vector<16x1xf32>
    %13 = vector.shape_cast %12 : vector<16x1xf32> to vector<1x16x1xf32>
    %14 = vector.broadcast %13 : vector<1x16x1xf32> to vector<2x16x196xf32>
    %15 = arith.mulf %10, %14 : vector<2x16x196xf32>
    %16 = arith.addf %9, %15 : vector<2x16x196xf32>
    %c0_15 = arith.constant 0 : index
    %c32 = arith.constant 32 : index
    %c0_16 = arith.constant 0 : index
    %17 = vector.load %arg1[%c0_15, %c32, %c0_16] : memref<2x144x196xf32, #tpu.memory_space<vmem>>, vector<2x16x196xf32>
    %18 = vector.extract_strided_slice %0 {offsets = [2, 0, 0], sizes = [1, 16, 1], strides = [1, 1, 1]} : vector<9x16x1xf32> to vector<1x16x1xf32>
    %19 = vector.shape_cast %18 : vector<1x16x1xf32> to vector<16x1xf32>
    %20 = vector.shape_cast %19 : vector<16x1xf32> to vector<1x16x1xf32>
    %21 = vector.broadcast %20 : vector<1x16x1xf32> to vector<2x16x196xf32>
    %22 = arith.mulf %17, %21 : vector<2x16x196xf32>
    %23 = arith.addf %16, %22 : vector<2x16x196xf32>
    %c0_17 = arith.constant 0 : index
    %c48 = arith.constant 48 : index
    %c0_18 = arith.constant 0 : index
    %24 = vector.load %arg1[%c0_17, %c48, %c0_18] : memref<2x144x196xf32, #tpu.memory_space<vmem>>, vector<2x16x196xf32>
    %25 = vector.extract_strided_slice %0 {offsets = [3, 0, 0], sizes = [1, 16, 1], strides = [1, 1, 1]} : vector<9x16x1xf32> to vector<1x16x1xf32>
    %26 = vector.shape_cast %25 : vector<1x16x1xf32> to vector<16x1xf32>
    %27 = vector.shape_cast %26 : vector<16x1xf32> to vector<1x16x1xf32>
    %28 = vector.broadcast %27 : vector<1x16x1xf32> to vector<2x16x196xf32>
    %29 = arith.mulf %24, %28 : vector<2x16x196xf32>
    %30 = arith.addf %23, %29 : vector<2x16x196xf32>
    %c0_19 = arith.constant 0 : index
    %c64 = arith.constant 64 : index
    %c0_20 = arith.constant 0 : index
    %31 = vector.load %arg1[%c0_19, %c64, %c0_20] : memref<2x144x196xf32, #tpu.memory_space<vmem>>, vector<2x16x196xf32>
    %32 = vector.extract_strided_slice %0 {offsets = [4, 0, 0], sizes = [1, 16, 1], strides = [1, 1, 1]} : vector<9x16x1xf32> to vector<1x16x1xf32>
    %33 = vector.shape_cast %32 : vector<1x16x1xf32> to vector<16x1xf32>
    %34 = vector.shape_cast %33 : vector<16x1xf32> to vector<1x16x1xf32>
    %35 = vector.broadcast %34 : vector<1x16x1xf32> to vector<2x16x196xf32>
    %36 = arith.mulf %31, %35 : vector<2x16x196xf32>
    %37 = arith.addf %30, %36 : vector<2x16x196xf32>
    %c0_21 = arith.constant 0 : index
    %c80 = arith.constant 80 : index
    %c0_22 = arith.constant 0 : index
    %38 = vector.load %arg1[%c0_21, %c80, %c0_22] : memref<2x144x196xf32, #tpu.memory_space<vmem>>, vector<2x16x196xf32>
    %39 = vector.extract_strided_slice %0 {offsets = [5, 0, 0], sizes = [1, 16, 1], strides = [1, 1, 1]} : vector<9x16x1xf32> to vector<1x16x1xf32>
    %40 = vector.shape_cast %39 : vector<1x16x1xf32> to vector<16x1xf32>
    %41 = vector.shape_cast %40 : vector<16x1xf32> to vector<1x16x1xf32>
    %42 = vector.broadcast %41 : vector<1x16x1xf32> to vector<2x16x196xf32>
    %43 = arith.mulf %38, %42 : vector<2x16x196xf32>
    %44 = arith.addf %37, %43 : vector<2x16x196xf32>
    %c0_23 = arith.constant 0 : index
    %c96 = arith.constant 96 : index
    %c0_24 = arith.constant 0 : index
    %45 = vector.load %arg1[%c0_23, %c96, %c0_24] : memref<2x144x196xf32, #tpu.memory_space<vmem>>, vector<2x16x196xf32>
    %46 = vector.extract_strided_slice %0 {offsets = [6, 0, 0], sizes = [1, 16, 1], strides = [1, 1, 1]} : vector<9x16x1xf32> to vector<1x16x1xf32>
    %47 = vector.shape_cast %46 : vector<1x16x1xf32> to vector<16x1xf32>
    %48 = vector.shape_cast %47 : vector<16x1xf32> to vector<1x16x1xf32>
    %49 = vector.broadcast %48 : vector<1x16x1xf32> to vector<2x16x196xf32>
    %50 = arith.mulf %45, %49 : vector<2x16x196xf32>
    %51 = arith.addf %44, %50 : vector<2x16x196xf32>
    %c0_25 = arith.constant 0 : index
    %c112 = arith.constant 112 : index
    %c0_26 = arith.constant 0 : index
    %52 = vector.load %arg1[%c0_25, %c112, %c0_26] : memref<2x144x196xf32, #tpu.memory_space<vmem>>, vector<2x16x196xf32>
    %53 = vector.extract_strided_slice %0 {offsets = [7, 0, 0], sizes = [1, 16, 1], strides = [1, 1, 1]} : vector<9x16x1xf32> to vector<1x16x1xf32>
    %54 = vector.shape_cast %53 : vector<1x16x1xf32> to vector<16x1xf32>
    %55 = vector.shape_cast %54 : vector<16x1xf32> to vector<1x16x1xf32>
    %56 = vector.broadcast %55 : vector<1x16x1xf32> to vector<2x16x196xf32>
    %57 = arith.mulf %52, %56 : vector<2x16x196xf32>
    %58 = arith.addf %51, %57 : vector<2x16x196xf32>
    %c0_27 = arith.constant 0 : index
    %c128 = arith.constant 128 : index
    %c0_28 = arith.constant 0 : index
    %59 = vector.load %arg1[%c0_27, %c128, %c0_28] : memref<2x144x196xf32, #tpu.memory_space<vmem>>, vector<2x16x196xf32>
    %60 = vector.extract_strided_slice %0 {offsets = [8, 0, 0], sizes = [1, 16, 1], strides = [1, 1, 1]} : vector<9x16x1xf32> to vector<1x16x1xf32>
    %61 = vector.shape_cast %60 : vector<1x16x1xf32> to vector<16x1xf32>
    %62 = vector.shape_cast %61 : vector<16x1xf32> to vector<1x16x1xf32>
    %63 = vector.broadcast %62 : vector<1x16x1xf32> to vector<2x16x196xf32>
    %64 = arith.mulf %59, %63 : vector<2x16x196xf32>
    %65 = arith.addf %58, %64 : vector<2x16x196xf32>
    %66 = vector.shape_cast %1 : vector<16x1xf32> to vector<1x16x1xf32>
    %67 = vector.broadcast %66 : vector<1x16x1xf32> to vector<2x16x196xf32>
    %68 = arith.addf %65, %67 : vector<2x16x196xf32>
    %cst = arith.constant 0.000000e+00 : f32
    %69 = vector.broadcast %cst : f32 to vector<2x16x196xf32>
    %70 = arith.maximumf %68, %69 : vector<2x16x196xf32>
    %71 = vector.extract_strided_slice %70 {offsets = [0, 0, 0], sizes = [2, 1, 196], strides = [1, 1, 1]} : vector<2x16x196xf32> to vector<2x1x196xf32>
    %72 = vector.extract_strided_slice %2 {offsets = [0, 0, 0, 0], sizes = [1, 1, 8, 1], strides = [1, 1, 1, 1]} : vector<4x4x8x1xf32> to vector<1x1x8x1xf32>
    %73 = vector.shape_cast %72 : vector<1x1x8x1xf32> to vector<8x1xf32>
    %74 = vector.shape_cast %73 : vector<8x1xf32> to vector<1x8x1xf32>
    %75 = vector.broadcast %71 : vector<2x1x196xf32> to vector<2x8x196xf32>
    %76 = vector.broadcast %74 : vector<1x8x1xf32> to vector<2x8x196xf32>
    %77 = arith.mulf %75, %76 : vector<2x8x196xf32>
    %78 = vector.extract_strided_slice %70 {offsets = [0, 1, 0], sizes = [2, 1, 196], strides = [1, 1, 1]} : vector<2x16x196xf32> to vector<2x1x196xf32>
    %79 = vector.extract_strided_slice %2 {offsets = [0, 1, 0, 0], sizes = [1, 1, 8, 1], strides = [1, 1, 1, 1]} : vector<4x4x8x1xf32> to vector<1x1x8x1xf32>
    %80 = vector.shape_cast %79 : vector<1x1x8x1xf32> to vector<8x1xf32>
    %81 = vector.shape_cast %80 : vector<8x1xf32> to vector<1x8x1xf32>
    %82 = vector.broadcast %78 : vector<2x1x196xf32> to vector<2x8x196xf32>
    %83 = vector.broadcast %81 : vector<1x8x1xf32> to vector<2x8x196xf32>
    %84 = arith.mulf %82, %83 : vector<2x8x196xf32>
    %85 = arith.addf %77, %84 : vector<2x8x196xf32>
    %86 = vector.extract_strided_slice %70 {offsets = [0, 2, 0], sizes = [2, 1, 196], strides = [1, 1, 1]} : vector<2x16x196xf32> to vector<2x1x196xf32>
    %87 = vector.extract_strided_slice %2 {offsets = [0, 2, 0, 0], sizes = [1, 1, 8, 1], strides = [1, 1, 1, 1]} : vector<4x4x8x1xf32> to vector<1x1x8x1xf32>
    %88 = vector.shape_cast %87 : vector<1x1x8x1xf32> to vector<8x1xf32>
    %89 = vector.shape_cast %88 : vector<8x1xf32> to vector<1x8x1xf32>
    %90 = vector.broadcast %86 : vector<2x1x196xf32> to vector<2x8x196xf32>
    %91 = vector.broadcast %89 : vector<1x8x1xf32> to vector<2x8x196xf32>
    %92 = arith.mulf %90, %91 : vector<2x8x196xf32>
    %93 = arith.addf %85, %92 : vector<2x8x196xf32>
    %94 = vector.extract_strided_slice %70 {offsets = [0, 3, 0], sizes = [2, 1, 196], strides = [1, 1, 1]} : vector<2x16x196xf32> to vector<2x1x196xf32>
    %95 = vector.extract_strided_slice %2 {offsets = [0, 3, 0, 0], sizes = [1, 1, 8, 1], strides = [1, 1, 1, 1]} : vector<4x4x8x1xf32> to vector<1x1x8x1xf32>
    %96 = vector.shape_cast %95 : vector<1x1x8x1xf32> to vector<8x1xf32>
    %97 = vector.shape_cast %96 : vector<8x1xf32> to vector<1x8x1xf32>
    %98 = vector.broadcast %94 : vector<2x1x196xf32> to vector<2x8x196xf32>
    %99 = vector.broadcast %97 : vector<1x8x1xf32> to vector<2x8x196xf32>
    %100 = arith.mulf %98, %99 : vector<2x8x196xf32>
    %101 = arith.addf %93, %100 : vector<2x8x196xf32>
    %102 = vector.extract_strided_slice %3 {offsets = [0, 0], sizes = [8, 1], strides = [1, 1]} : vector<32x1xf32> to vector<8x1xf32>
    %103 = vector.shape_cast %102 : vector<8x1xf32> to vector<1x8x1xf32>
    %104 = vector.broadcast %103 : vector<1x8x1xf32> to vector<2x8x196xf32>
    %105 = arith.addf %101, %104 : vector<2x8x196xf32>
    %cst_29 = arith.constant 0.000000e+00 : f32
    %106 = vector.broadcast %cst_29 : f32 to vector<2x8x196xf32>
    %107 = arith.maximumf %105, %106 : vector<2x8x196xf32>
    %c0_30 = arith.constant 0 : index
    %c0_31 = arith.constant 0 : index
    %c0_32 = arith.constant 0 : index
    %108 = vector.load %arg6[%c0_30, %c0_31, %c0_32] : memref<2x32x196xf32, #tpu.memory_space<vmem>>, vector<2x8x196xf32>
    tpu.vector_store %arg6[%c0_30, %c0_31, %c0_32], %107 {strides = array<i32>} : memref<2x32x196xf32, #tpu.memory_space<vmem>>, vector<2x8x196xf32>,
    %109 = vector.extract_strided_slice %70 {offsets = [0, 4, 0], sizes = [2, 1, 196], strides = [1, 1, 1]} : vector<2x16x196xf32> to vector<2x1x196xf32>
    %110 = vector.extract_strided_slice %2 {offsets = [1, 0, 0, 0], sizes = [1, 1, 8, 1], strides = [1, 1, 1, 1]} : vector<4x4x8x1xf32> to vector<1x1x8x1xf32>
    %111 = vector.shape_cast %110 : vector<1x1x8x1xf32> to vector<8x1xf32>
    %112 = vector.shape_cast %111 : vector<8x1xf32> to vector<1x8x1xf32>
    %113 = vector.broadcast %109 : vector<2x1x196xf32> to vector<2x8x196xf32>
    %114 = vector.broadcast %112 : vector<1x8x1xf32> to vector<2x8x196xf32>
    %115 = arith.mulf %113, %114 : vector<2x8x196xf32>
    %116 = vector.extract_strided_slice %70 {offsets = [0, 5, 0], sizes = [2, 1, 196], strides = [1, 1, 1]} : vector<2x16x196xf32> to vector<2x1x196xf32>
    %117 = vector.extract_strided_slice %2 {offsets = [1, 1, 0, 0], sizes = [1, 1, 8, 1], strides = [1, 1, 1, 1]} : vector<4x4x8x1xf32> to vector<1x1x8x1xf32>
    %118 = vector.shape_cast %117 : vector<1x1x8x1xf32> to vector<8x1xf32>
    %119 = vector.shape_cast %118 : vector<8x1xf32> to vector<1x8x1xf32>
    %120 = vector.broadcast %116 : vector<2x1x196xf32> to vector<2x8x196xf32>
    %121 = vector.broadcast %119 : vector<1x8x1xf32> to vector<2x8x196xf32>
    %122 = arith.mulf %120, %121 : vector<2x8x196xf32>
    %123 = arith.addf %115, %122 : vector<2x8x196xf32>
    %124 = vector.extract_strided_slice %70 {offsets = [0, 6, 0], sizes = [2, 1, 196], strides = [1, 1, 1]} : vector<2x16x196xf32> to vector<2x1x196xf32>
    %125 = vector.extract_strided_slice %2 {offsets = [1, 2, 0, 0], sizes = [1, 1, 8, 1], strides = [1, 1, 1, 1]} : vector<4x4x8x1xf32> to vector<1x1x8x1xf32>
    %126 = vector.shape_cast %125 : vector<1x1x8x1xf32> to vector<8x1xf32>
    %127 = vector.shape_cast %126 : vector<8x1xf32> to vector<1x8x1xf32>
    %128 = vector.broadcast %124 : vector<2x1x196xf32> to vector<2x8x196xf32>
    %129 = vector.broadcast %127 : vector<1x8x1xf32> to vector<2x8x196xf32>
    %130 = arith.mulf %128, %129 : vector<2x8x196xf32>
    %131 = arith.addf %123, %130 : vector<2x8x196xf32>
    %132 = vector.extract_strided_slice %70 {offsets = [0, 7, 0], sizes = [2, 1, 196], strides = [1, 1, 1]} : vector<2x16x196xf32> to vector<2x1x196xf32>
    %133 = vector.extract_strided_slice %2 {offsets = [1, 3, 0, 0], sizes = [1, 1, 8, 1], strides = [1, 1, 1, 1]} : vector<4x4x8x1xf32> to vector<1x1x8x1xf32>
    %134 = vector.shape_cast %133 : vector<1x1x8x1xf32> to vector<8x1xf32>
    %135 = vector.shape_cast %134 : vector<8x1xf32> to vector<1x8x1xf32>
    %136 = vector.broadcast %132 : vector<2x1x196xf32> to vector<2x8x196xf32>
    %137 = vector.broadcast %135 : vector<1x8x1xf32> to vector<2x8x196xf32>
    %138 = arith.mulf %136, %137 : vector<2x8x196xf32>
    %139 = arith.addf %131, %138 : vector<2x8x196xf32>
    %140 = vector.extract_strided_slice %3 {offsets = [8, 0], sizes = [8, 1], strides = [1, 1]} : vector<32x1xf32> to vector<8x1xf32>
    %141 = vector.shape_cast %140 : vector<8x1xf32> to vector<1x8x1xf32>
    %142 = vector.broadcast %141 : vector<1x8x1xf32> to vector<2x8x196xf32>
    %143 = arith.addf %139, %142 : vector<2x8x196xf32>
    %cst_33 = arith.constant 0.000000e+00 : f32
    %144 = vector.broadcast %cst_33 : f32 to vector<2x8x196xf32>
    %145 = arith.maximumf %143, %144 : vector<2x8x196xf32>
    %c0_34 = arith.constant 0 : index
    %c8 = arith.constant 8 : index
    %c0_35 = arith.constant 0 : index
    %146 = vector.load %arg6[%c0_34, %c8, %c0_35] : memref<2x32x196xf32, #tpu.memory_space<vmem>>, vector<2x8x196xf32>
    tpu.vector_store %arg6[%c0_34, %c8, %c0_35], %145 {strides = array<i32>} : memref<2x32x196xf32, #tpu.memory_space<vmem>>, vector<2x8x196xf32>,
    %147 = vector.extract_strided_slice %70 {offsets = [0, 8, 0], sizes = [2, 1, 196], strides = [1, 1, 1]} : vector<2x16x196xf32> to vector<2x1x196xf32>
    %148 = vector.extract_strided_slice %2 {offsets = [2, 0, 0, 0], sizes = [1, 1, 8, 1], strides = [1, 1, 1, 1]} : vector<4x4x8x1xf32> to vector<1x1x8x1xf32>
    %149 = vector.shape_cast %148 : vector<1x1x8x1xf32> to vector<8x1xf32>
    %150 = vector.shape_cast %149 : vector<8x1xf32> to vector<1x8x1xf32>
    %151 = vector.broadcast %147 : vector<2x1x196xf32> to vector<2x8x196xf32>
    %152 = vector.broadcast %150 : vector<1x8x1xf32> to vector<2x8x196xf32>
    %153 = arith.mulf %151, %152 : vector<2x8x196xf32>
    %154 = vector.extract_strided_slice %70 {offsets = [0, 9, 0], sizes = [2, 1, 196], strides = [1, 1, 1]} : vector<2x16x196xf32> to vector<2x1x196xf32>
    %155 = vector.extract_strided_slice %2 {offsets = [2, 1, 0, 0], sizes = [1, 1, 8, 1], strides = [1, 1, 1, 1]} : vector<4x4x8x1xf32> to vector<1x1x8x1xf32>
    %156 = vector.shape_cast %155 : vector<1x1x8x1xf32> to vector<8x1xf32>
    %157 = vector.shape_cast %156 : vector<8x1xf32> to vector<1x8x1xf32>
    %158 = vector.broadcast %154 : vector<2x1x196xf32> to vector<2x8x196xf32>
    %159 = vector.broadcast %157 : vector<1x8x1xf32> to vector<2x8x196xf32>
    %160 = arith.mulf %158, %159 : vector<2x8x196xf32>
    %161 = arith.addf %153, %160 : vector<2x8x196xf32>
    %162 = vector.extract_strided_slice %70 {offsets = [0, 10, 0], sizes = [2, 1, 196], strides = [1, 1, 1]} : vector<2x16x196xf32> to vector<2x1x196xf32>
    %163 = vector.extract_strided_slice %2 {offsets = [2, 2, 0, 0], sizes = [1, 1, 8, 1], strides = [1, 1, 1, 1]} : vector<4x4x8x1xf32> to vector<1x1x8x1xf32>
    %164 = vector.shape_cast %163 : vector<1x1x8x1xf32> to vector<8x1xf32>
    %165 = vector.shape_cast %164 : vector<8x1xf32> to vector<1x8x1xf32>
    %166 = vector.broadcast %162 : vector<2x1x196xf32> to vector<2x8x196xf32>
    %167 = vector.broadcast %165 : vector<1x8x1xf32> to vector<2x8x196xf32>
    %168 = arith.mulf %166, %167 : vector<2x8x196xf32>
    %169 = arith.addf %161, %168 : vector<2x8x196xf32>
    %170 = vector.extract_strided_slice %70 {offsets = [0, 11, 0], sizes = [2, 1, 196], strides = [1, 1, 1]} : vector<2x16x196xf32> to vector<2x1x196xf32>
    %171 = vector.extract_strided_slice %2 {offsets = [2, 3, 0, 0], sizes = [1, 1, 8, 1], strides = [1, 1, 1, 1]} : vector<4x4x8x1xf32> to vector<1x1x8x1xf32>
    %172 = vector.shape_cast %171 : vector<1x1x8x1xf32> to vector<8x1xf32>
    %173 = vector.shape_cast %172 : vector<8x1xf32> to vector<1x8x1xf32>
    %174 = vector.broadcast %170 : vector<2x1x196xf32> to vector<2x8x196xf32>
    %175 = vector.broadcast %173 : vector<1x8x1xf32> to vector<2x8x196xf32>
    %176 = arith.mulf %174, %175 : vector<2x8x196xf32>
    %177 = arith.addf %169, %176 : vector<2x8x196xf32>
    %178 = vector.extract_strided_slice %3 {offsets = [16, 0], sizes = [8, 1], strides = [1, 1]} : vector<32x1xf32> to vector<8x1xf32>
    %179 = vector.shape_cast %178 : vector<8x1xf32> to vector<1x8x1xf32>
    %180 = vector.broadcast %179 : vector<1x8x1xf32> to vector<2x8x196xf32>
    %181 = arith.addf %177, %180 : vector<2x8x196xf32>
    %cst_36 = arith.constant 0.000000e+00 : f32
    %182 = vector.broadcast %cst_36 : f32 to vector<2x8x196xf32>
    %183 = arith.maximumf %181, %182 : vector<2x8x196xf32>
    %c0_37 = arith.constant 0 : index
    %c16_38 = arith.constant 16 : index
    %c0_39 = arith.constant 0 : index
    %184 = vector.load %arg6[%c0_37, %c16_38, %c0_39] : memref<2x32x196xf32, #tpu.memory_space<vmem>>, vector<2x8x196xf32>
    tpu.vector_store %arg6[%c0_37, %c16_38, %c0_39], %183 {strides = array<i32>} : memref<2x32x196xf32, #tpu.memory_space<vmem>>, vector<2x8x196xf32>,
    %185 = vector.extract_strided_slice %70 {offsets = [0, 12, 0], sizes = [2, 1, 196], strides = [1, 1, 1]} : vector<2x16x196xf32> to vector<2x1x196xf32>
    %186 = vector.extract_strided_slice %2 {offsets = [3, 0, 0, 0], sizes = [1, 1, 8, 1], strides = [1, 1, 1, 1]} : vector<4x4x8x1xf32> to vector<1x1x8x1xf32>
    %187 = vector.shape_cast %186 : vector<1x1x8x1xf32> to vector<8x1xf32>
    %188 = vector.shape_cast %187 : vector<8x1xf32> to vector<1x8x1xf32>
    %189 = vector.broadcast %185 : vector<2x1x196xf32> to vector<2x8x196xf32>
    %190 = vector.broadcast %188 : vector<1x8x1xf32> to vector<2x8x196xf32>
    %191 = arith.mulf %189, %190 : vector<2x8x196xf32>
    %192 = vector.extract_strided_slice %70 {offsets = [0, 13, 0], sizes = [2, 1, 196], strides = [1, 1, 1]} : vector<2x16x196xf32> to vector<2x1x196xf32>
    %193 = vector.extract_strided_slice %2 {offsets = [3, 1, 0, 0], sizes = [1, 1, 8, 1], strides = [1, 1, 1, 1]} : vector<4x4x8x1xf32> to vector<1x1x8x1xf32>
    %194 = vector.shape_cast %193 : vector<1x1x8x1xf32> to vector<8x1xf32>
    %195 = vector.shape_cast %194 : vector<8x1xf32> to vector<1x8x1xf32>
    %196 = vector.broadcast %192 : vector<2x1x196xf32> to vector<2x8x196xf32>
    %197 = vector.broadcast %195 : vector<1x8x1xf32> to vector<2x8x196xf32>
    %198 = arith.mulf %196, %197 : vector<2x8x196xf32>
    %199 = arith.addf %191, %198 : vector<2x8x196xf32>
    %200 = vector.extract_strided_slice %70 {offsets = [0, 14, 0], sizes = [2, 1, 196], strides = [1, 1, 1]} : vector<2x16x196xf32> to vector<2x1x196xf32>
    %201 = vector.extract_strided_slice %2 {offsets = [3, 2, 0, 0], sizes = [1, 1, 8, 1], strides = [1, 1, 1, 1]} : vector<4x4x8x1xf32> to vector<1x1x8x1xf32>
    %202 = vector.shape_cast %201 : vector<1x1x8x1xf32> to vector<8x1xf32>
    %203 = vector.shape_cast %202 : vector<8x1xf32> to vector<1x8x1xf32>
    %204 = vector.broadcast %200 : vector<2x1x196xf32> to vector<2x8x196xf32>
    %205 = vector.broadcast %203 : vector<1x8x1xf32> to vector<2x8x196xf32>
    %206 = arith.mulf %204, %205 : vector<2x8x196xf32>
    %207 = arith.addf %199, %206 : vector<2x8x196xf32>
    %208 = vector.extract_strided_slice %70 {offsets = [0, 15, 0], sizes = [2, 1, 196], strides = [1, 1, 1]} : vector<2x16x196xf32> to vector<2x1x196xf32>
    %209 = vector.extract_strided_slice %2 {offsets = [3, 3, 0, 0], sizes = [1, 1, 8, 1], strides = [1, 1, 1, 1]} : vector<4x4x8x1xf32> to vector<1x1x8x1xf32>
    %210 = vector.shape_cast %209 : vector<1x1x8x1xf32> to vector<8x1xf32>
    %211 = vector.shape_cast %210 : vector<8x1xf32> to vector<1x8x1xf32>
    %212 = vector.broadcast %208 : vector<2x1x196xf32> to vector<2x8x196xf32>
    %213 = vector.broadcast %211 : vector<1x8x1xf32> to vector<2x8x196xf32>
    %214 = arith.mulf %212, %213 : vector<2x8x196xf32>
    %215 = arith.addf %207, %214 : vector<2x8x196xf32>
    %216 = vector.extract_strided_slice %3 {offsets = [24, 0], sizes = [8, 1], strides = [1, 1]} : vector<32x1xf32> to vector<8x1xf32>
    %217 = vector.shape_cast %216 : vector<8x1xf32> to vector<1x8x1xf32>
    %218 = vector.broadcast %217 : vector<1x8x1xf32> to vector<2x8x196xf32>
    %219 = arith.addf %215, %218 : vector<2x8x196xf32>
    %cst_40 = arith.constant 0.000000e+00 : f32
    %220 = vector.broadcast %cst_40 : f32 to vector<2x8x196xf32>
    %221 = arith.maximumf %219, %220 : vector<2x8x196xf32>
    %c0_41 = arith.constant 0 : index
    %c24 = arith.constant 24 : index
    %c0_42 = arith.constant 0 : index
    %222 = vector.load %arg6[%c0_41, %c24, %c0_42] : memref<2x32x196xf32, #tpu.memory_space<vmem>>, vector<2x8x196xf32>
    tpu.vector_store %arg6[%c0_41, %c24, %c0_42], %221 {strides = array<i32>} : memref<2x32x196xf32, #tpu.memory_space<vmem>>, vector<2x8x196xf32>,
    return
  }
  func.func @transform_0(%arg0: i32) -> (i32, i32, i32) {
    %c0_i32 = arith.constant 0 : i32
    %c0_i32_0 = arith.constant 0 : i32
    %c0_i32_1 = arith.constant 0 : i32
    return %arg0, %c0_i32, %c0_i32_0 : i32, i32, i32
  }
  func.func @transform_1(%arg0: i32) -> (i32, i32, i32) {
    %c0_i32 = arith.constant 0 : i32
    %c0_i32_0 = arith.constant 0 : i32
    %c0_i32_1 = arith.constant 0 : i32
    %c0_i32_2 = arith.constant 0 : i32
    return %c0_i32, %c0_i32_0, %c0_i32_1 : i32, i32, i32
  }
  func.func @transform_2(%arg0: i32) -> (i32, i32) {
    %c0_i32 = arith.constant 0 : i32
    %c0_i32_0 = arith.constant 0 : i32
    %c0_i32_1 = arith.constant 0 : i32
    return %c0_i32, %c0_i32_0 : i32, i32
  }
  func.func @transform_3(%arg0: i32) -> (i32, i32, i32, i32) {
    %c0_i32 = arith.constant 0 : i32
    %c0_i32_0 = arith.constant 0 : i32
    %c0_i32_1 = arith.constant 0 : i32
    %c0_i32_2 = arith.constant 0 : i32
    %c0_i32_3 = arith.constant 0 : i32
    return %c0_i32, %c0_i32_0, %c0_i32_1, %c0_i32_2 : i32, i32, i32, i32
  }
  func.func @transform_4(%arg0: i32) -> (i32, i32) {
    %c0_i32 = arith.constant 0 : i32
    %c0_i32_0 = arith.constant 0 : i32
    %c0_i32_1 = arith.constant 0 : i32
    return %c0_i32, %c0_i32_0 : i32, i32
  }
  func.func @transform_5(%arg0: i32) -> (i32, i32, i32) {
    %c0_i32 = arith.constant 0 : i32
    %c0_i32_0 = arith.constant 0 : i32
    %c0_i32_1 = arith.constant 0 : i32
    return %arg0, %c0_i32, %c0_i32_0 : i32, i32, i32
  }
}

</mosaic_0001>

<bundles_post_ra>
// kernel: tpu_custom_call.1
= control target key start
LH: loop header
LB: loop body
LE: loop exit
PB: predicated region body
PF: predicated region fallthrough
CT: control target
= control target key end

     0   :  { %10 = vsyncpa [#allocation3], 0  ;;  %s1186_s0 = inlined_call_operand.hbm [shape: f32[2,144,196], index: 0, kind: input, shape index: {}]   ;;  %s1187_s1 = inlined_call_operand.vmem [shape: f32[9,16,1], index: 1, kind: input, shape index: {}]   ;;  %s1188_s2 = inlined_call_operand.vmem [shape: f32[16,1], index: 2, kind: input, shape index: {}]   ;;  %s1189_s3 = inlined_call_operand.vmem [shape: f32[4,4,8,1], index: 3, kind: input, shape index: {}]   ;;  %s1190_s4 = inlined_call_operand.vmem [shape: f32[32,1], index: 4, kind: input, shape index: {}]   ;;  %s1191_s5 = inlined_call_operand.hbm [shape: f32[2,32,196], index: 5, kind: output, shape index: {}]  }
   0x1   :  { %11 = vsyncpa [#allocation4], 0  ;;  %s16_s20 = sshll.u32 %s1186_s0, 4  ;;  %s805_s21 = smov [#allocation2]   ;;  %s17_s20 = int_to_ptr.hbm [resolvable:$true] %s16_s20 }
   0x2   :  { %s18_s22 = sshll.u32 %s805_s21, 4  ;;  %s806_s23 = smov 256   ;;  %s19_s22 = int_to_ptr.vmem [resolvable:$true] %s18_s22 }
   0x3   :  { %s807_s24 = smov 16  }
   0x4   :  { %24 = dma.hbm_to_vmem [thread:$0]  %s17_s20, 9216, %s19_s22, [#allocation3], %s806_s23, %s806_s23, %s807_s24  }
   0x5   :  { %801 = dma.done.wait [#allocation3], 9216  }
   0x6   :  { %802 = vsyncadd [#allocation3], 4294958080  ;;  %v808_v0 = vmov 0   ;;  %v41_v1 = vld [vmem:[%s1187_s1 + $0x20] sm:$0xff]  ;;  %v39_v2 = vld [vmem:[%s1187_s1 + $0x10] sm:$0xff]  ;;  %vm479_vm0 = vcmask 556032  }
   0x7   :  { %752 = vset.pattern.permute.xlu2 %v808_v0  ;;  %751 = vset.pattern.permute.xlu1 %v808_v0  ;;  %v37_v3 = vld [vmem:[%s1187_s1] sm:$0xff]  ;;  %v42_v4 = vld [vmem:[%s1187_s1 + $0x28] sm:$0xff]  ;;  %v40_v5 = vld [vmem:[%s1187_s1 + $0x18] sm:$0xff]  ;;  %s732_s30 = sshll.u32 %s1191_s5, 4  ;;  %s733_s30 = int_to_ptr.hbm [resolvable:$true] %s732_s30 }
   0x8   :  { %750 = vset.pattern.permute.xlu0 %v808_v0  ;;  %147 = vperm.xlu2 %752, %v41_v1   ;;  %v38_v6 = vld [vmem:[%s1187_s1 + $0x8] sm:$0xff]  ;;  %v45_v7 = vld [vmem:[%s1187_s1 + $0x40] sm:$0xff]  ;;  %v44_v8 = vld [vmem:[%s1187_s1 + $0x38] sm:$0xff] }
   0x9   :  { %113 = vperm.xlu1 %751, %v39_v2   ;;  %87 = vperm.xlu0 %750, %v37_v3   ;;  %v43_v9 = vld [vmem:[%s1187_s1 + $0x30] sm:$0xff]  ;;  %v48_v10 = vld [vmem:[%s1187_s1 + $0x58] sm:$0xff]  ;;  %v46_v12 = vld [vmem:[%s1187_s1 + $0x48] sm:$0xff] }
   0xa   :  { %v47_v11 = vld [vmem:[%s1187_s1 + $0x50] sm:$0xff]  ;;  %v50_v14 = vld [vmem:[%s1187_s1 + $0x68] sm:$0xff]  ;;  %v49_v15 = vld [vmem:[%s1187_s1 + $0x60] sm:$0xff] }
   0xb   :  { %v51_v13 = vld [vmem:[%s1187_s1 + $0x70] sm:$0xff]  ;;  %v54_v16 = vld [vmem:[%s1187_s1 + $0x88] sm:$0xff]  ;;  %v53_v17 = vld [vmem:[%s1187_s1 + $0x80] sm:$0xff] }
   0xc   :  { %v52_v18 = vld [vmem:[%s1187_s1 + $0x78] sm:$0xff]  ;;  %v57_v19 = vld [vmem:[%s1189_s3] sm:$0xff]  ;;  %v56_v20 = vld [vmem:[%s1188_s2 + $0x8] sm:$0xff] }
   0xd   :  { %v55_v21 = vld [vmem:[%s1188_s2] sm:$0xff]  ;;  %v60_v22 = vld [vmem:[%s1189_s3 + $0x18] sm:$0xff]  ;;  %v59_v23 = vld [vmem:[%s1189_s3 + $0x10] sm:$0xff] }
   0xe   :  { %v58_v24 = vld [vmem:[%s1189_s3 + $0x8] sm:$0xff]  ;;  %v61_v26 = vld [vmem:[%s1189_s3 + $0x20] sm:$0xff]  ;;  %v64_v29 = vld [vmem:[%s1189_s3 + $0x38] sm:$0xff] }
   0xf   :  { %v62_v25 = vld [vmem:[%s1189_s3 + $0x28] sm:$0xff]  ;;  %v73_v27 = vld [vmem:[%s1190_s4] sm:$0xff]  ;;  %v63_v30 = vld [vmem:[%s1189_s3 + $0x30] sm:$0xff] }
  0x10   :  { %152 = vperm.xlu2 %752, %v42_v4   ;;  %v74_v28 = vld [vmem:[%s1190_s4 + $0x8] sm:$0xff]  ;;  %v69_v31 = vld [vmem:[%s1189_s3 + $0x60] sm:$0xff]  ;;  %v71_v34 = vld [vmem:[%s1189_s3 + $0x70] sm:$0xff] }
  0x11   :  { %118 = vperm.xlu1 %751, %v40_v5   ;;  %92 = vperm.xlu0 %750, %v38_v6   ;;  %v66_v32 = vld [vmem:[%s1189_s3 + $0x48] sm:$0xff]  ;;  %v65_v33 = vld [vmem:[%s1189_s3 + $0x40] sm:$0xff]  ;;  %v67_v35 = vld [vmem:[%s1189_s3 + $0x50] sm:$0xff] }
  0x12   :  { %v70_v36 = vld [vmem:[%s1189_s3 + $0x68] sm:$0xff]  ;;  %v75_v38 = vld [vmem:[%s1190_s4 + $0x10] sm:$0xff]  ;;  %v72_v39 = vld [vmem:[%s1189_s3 + $0x78] sm:$0xff] }
  0x13   :  { %v68_v40 = vld [vmem:[%s1189_s3 + $0x58] sm:$0xff]  ;;  %v137_v50 = vld [vmem:[#allocation2 + $0x40] sm:$0xff]  ;;  %v138_v51 = vld [vmem:[#allocation2 + $0x48] sm:$0xff]  ;;  %s809_s3 = smov [#allocation5]  }
  0x14   :  { %v76_v42 = vld [vmem:[%s1190_s4 + $0x18] sm:$0xff]  ;;  %v141_v52 = vld [vmem:[#allocation2 + $0x160] sm:$0xff]  ;;  %v142_v53 = vld [vmem:[#allocation2 + $0x168] sm:$0xff]  ;;  %s730_s4 = sshll.u32 %s809_s3, 4  ;;  %s731_s4 = int_to_ptr.vmem [resolvable:$true] %s730_s4 }
  0x15   :  { %v103_v54 = vld [vmem:[#allocation2 + $0x20] sm:$0xff]  ;;  %v104_v55 = vld [vmem:[#allocation2 + $0x28] sm:$0xff]  ;;  %v105_v62 = vld [vmem:[#allocation2 + $0x30] sm:$0xff] }
  0x16   :  { %v107_v56 = vld [vmem:[#allocation2 + $0x140] sm:$0xff]  ;;  %v108_v57 = vld [vmem:[#allocation2 + $0x148] sm:$0xff]  ;;  %v106_v63 = vld [vmem:[#allocation2 + $0x38] sm:$0xff] }
  0x17   :  { %v77_v58 = vld [vmem:[#allocation2] sm:$0xff]  ;;  %v78_v59 = vld [vmem:[#allocation2 + $0x8] sm:$0xff]  ;;  %v139_v4 = vld [vmem:[#allocation2 + $0x50] sm:$0xff] }
  0x18   :  { %215 = vperm.xlu2 %752, %v45_v7   ;;  %v81_v60 = vld [vmem:[#allocation2 + $0x120] sm:$0xff]  ;;  %v82_v61 = vld [vmem:[#allocation2 + $0x128] sm:$0xff]  ;;  %v140_v5 = vld [vmem:[#allocation2 + $0x58] sm:$0xff] }
  0x19   :  { %186 = vperm.xlu1 %751, %v44_v8   ;;  %181 = vperm.xlu0 %750, %v43_v9   ;;  %v109_v6 = vld [vmem:[#allocation2 + $0x150] sm:$0xff]  ;;  %v110_v7 = vld [vmem:[#allocation2 + $0x158] sm:$0xff] }
  0x1a   :  { %v79_v8 = vld [vmem:[#allocation2 + $0x10] sm:$0xff] }
  0x20   :  { %254 = vperm.xlu2 %752, %v48_v10  }
  0x21   :  { %249 = vperm.xlu1 %751, %v47_v11   ;;  %220 = vperm.xlu0 %750, %v46_v12  }
  0x28   :  { %317 = vperm.xlu2 %752, %v51_v13   ;;  %v80_v13 = vld [vmem:[#allocation2 + $0x18] sm:$0xff] }
  0x29   :  { %288 = vperm.xlu1 %751, %v50_v14   ;;  %283 = vperm.xlu0 %750, %v49_v15   ;;  %v83_v14 = vld [vmem:[#allocation2 + $0x130] sm:$0xff]  ;;  %v84_v15 = vld [vmem:[#allocation2 + $0x138] sm:$0xff] }
  0x30   :  { %356 = vperm.xlu2 %752, %v54_v16  }
  0x31   :  { %351 = vperm.xlu1 %751, %v53_v17   ;;  %322 = vperm.xlu0 %750, %v52_v18   ;;  %v143_v18 = vld [vmem:[#allocation2 + $0x170] sm:$0xff] }
  0x38   :  { %407 = vperm.xlu2 %752, %v57_v19   ;;  %v144_v19 = vld [vmem:[#allocation2 + $0x178] sm:$0xff] }
  0x39   :  { %382 = vperm.xlu1 %751, %v56_v20   ;;  %377 = vperm.xlu0 %750, %v55_v21   ;;  %v205_v20 = vld [vmem:[#allocation2 + $0x80] sm:$0xff] }
  0x40   :  { %454 = vperm.xlu2 %752, %v60_v22  }
  0x41   :  { %437 = vperm.xlu1 %751, %v59_v23   ;;  %420 = vperm.xlu0 %750, %v58_v24  }
  0x48   :  { %502 = vperm.xlu2 %752, %v62_v25  }
  0x49   :  { %489 = vperm.xlu1 %751, %v61_v26   ;;  %467 = vperm.xlu0 %750, %v73_v27   ;;  %v206_v26 = vld [vmem:[#allocation2 + $0x88] sm:$0xff]  ;;  %v209_v27 = vld [vmem:[#allocation2 + $0x1a0] sm:$0xff] }
  0x50   :  { %549 = vperm.xlu2 %752, %v74_v28   ;;  %v210_v28 = vld [vmem:[#allocation2 + $0x1a8] sm:$0xff] }
  0x51   :  { %536 = vperm.xlu1 %751, %v64_v29   ;;  %519 = vperm.xlu0 %750, %v63_v30  }
  0x58   :  { %651 = vperm.xlu2 %752, %v69_v31  }
  0x59   :  { %583 = vperm.xlu1 %751, %v66_v32   ;;  %570 = vperm.xlu0 %750, %v65_v33  }
  0x60   :  { %681 = vperm.xlu2 %752, %v71_v34  }
  0x61   :  { %600 = vperm.xlu1 %751, %v67_v35   ;;  %664 = vperm.xlu0 %750, %v70_v36  }
  0x62   :  { %v148_v37 = vpop.permute.xlu2 %147 }
  0x63   :  { %v974_v0 = vmul.f32 %v148_v37, %v137_v50  ;;  %v976_v1 = vmul.f32 %v148_v37, %v138_v51  ;;  %v978_v2 = vmul.f32 %v148_v37, %v141_v52  ;;  %v980_v3 = vmul.f32 %v148_v37, %v142_v53  ;;  %v245_v51 = vld [vmem:[#allocation2 + $0x1d0] sm:$0xff]  ;;  %v246_v52 = vld [vmem:[#allocation2 + $0x1d8] sm:$0xff]  ;;  %v171_v53 = vld [vmem:[#allocation2 + $0x60] sm:$0xff] }
  0x68   :  { %630 = vperm.xlu2 %752, %v75_v38  }
  0x69   :  { %698 = vperm.xlu1 %751, %v72_v39   ;;  %617 = vperm.xlu0 %750, %v68_v40  }
  0x6a   :  { %v963_v41 = vpop.permute.xlu2 %152 }
  0x6b   :  { %v157_v37 = vmul.f32 %v963_v41, %v139_v4  ;;  %v158_v38 = vmul.f32 %v963_v41, %v140_v5  ;;  %v161_v39 = vmul.f32 %v963_v41, %v143_v18  ;;  %v162_v40 = vmul.f32 %v963_v41, %v144_v19 }
  0x71   :  { %711 = vperm.xlu0 %750, %v76_v42   ;;  %v241_v42 = vld [vmem:[#allocation2 + $0xb0] sm:$0xff] }
  0x72   :  { %v968_v43 = vpop.permute.xlu2 %215 }
  0x73   :  { %v994_v50 = vmul.f32 %v968_v43, %v206_v26 }
  0x7a   :  { %v970_v44 = vpop.permute.xlu2 %254 }
  0x7b   :  { %v114_v45 = vpop.permute.xlu1 %113  ;;  %v88_v46 = vpop.permute.xlu0 %87  ;;  %v1003_v4 = vmul.f32 %v970_v44, %v241_v42  ;;  %v1009_v5 = vmul.f32 %v970_v44, %v245_v51 }
  0x7c   :  { %v121_v9 = vmul.f32 %v114_v45, %v103_v54  ;;  %v122_v10 = vmul.f32 %v114_v45, %v104_v55  ;;  %v125_v11 = vmul.f32 %v114_v45, %v107_v56  ;;  %v126_v12 = vmul.f32 %v114_v45, %v108_v57  ;;  %v242_v45 = vld [vmem:[#allocation2 + $0xb8] sm:$0xff]  ;;  %v172_v57 = vld [vmem:[#allocation2 + $0x68] sm:$0xff] }
  0x7d   :  { %v95_v21 = vmul.f32 %v88_v46, %v77_v58  ;;  %v96_v22 = vmul.f32 %v88_v46, %v78_v59  ;;  %v99_v23 = vmul.f32 %v88_v46, %v81_v60  ;;  %v100_v24 = vmul.f32 %v88_v46, %v82_v61  ;;  %v175_v58 = vld [vmem:[#allocation2 + $0x180] sm:$0xff]  ;;  %v176_v59 = vld [vmem:[#allocation2 + $0x188] sm:$0xff] }
  0x7e   :  { %v991_v46 = vmul.f32 %v968_v43, %v205_v20  ;;  %v307_v20 = vld [vmem:[#allocation2 + $0xe0] sm:$0xff] }
  0x7f   :  { %v129_v54 = vadd.f32 %v121_v9, %v95_v21  ;;  %v130_v55 = vadd.f32 %v122_v10, %v96_v22  ;;  %v133_v41 = vadd.f32 %v125_v11, %v99_v23  ;;  %v134_v56 = vadd.f32 %v126_v12, %v100_v24  ;;  %v174_v10 = vld [vmem:[#allocation2 + $0x78] sm:$0xff]  ;;  %v177_v11 = vld [vmem:[#allocation2 + $0x190] sm:$0xff] }
  0x80   :  { %v178_v12 = vld [vmem:[#allocation2 + $0x198] sm:$0xff]  ;;  %v207_v24 = vld [vmem:[#allocation2 + $0x90] sm:$0xff] }
  0x81   :  { %v163_v21 = vadd.f32 %v974_v0, %v129_v54  ;;  %v164_v22 = vadd.f32 %v976_v1, %v130_v55  ;;  %v168_v23 = vadd.f32 %v980_v3, %v134_v56  ;;  %v240_v55 = vld [vmem:[#allocation2 + $0xa8] sm:$0xff] }
  0x82   :  { %v972_v47 = vpop.permute.xlu2 %317 }
  0x83   :  { %v119_v48 = vpop.permute.xlu1 %118  ;;  %v93_v49 = vpop.permute.xlu0 %92  ;;  %v1027_v51 = vmul.f32 %v972_v47, %v307_v20 }
  0x84   :  { %v123_v29 = vmul.f32 %v119_v48, %v105_v62  ;;  %v124_v30 = vmul.f32 %v119_v48, %v106_v63  ;;  %v127_v31 = vmul.f32 %v119_v48, %v109_v6  ;;  %v128_v32 = vmul.f32 %v119_v48, %v110_v7  ;;  %v173_v7 = vld [vmem:[#allocation2 + $0x70] sm:$0xff] }
  0x85   :  { %v97_v33 = vmul.f32 %v93_v49, %v79_v8  ;;  %v98_v34 = vmul.f32 %v93_v49, %v80_v13  ;;  %v101_v35 = vmul.f32 %v93_v49, %v83_v14  ;;  %v102_v36 = vmul.f32 %v93_v49, %v84_v15 }
  0x86   :  { %v997_v48 = vmul.f32 %v968_v43, %v209_v27  ;;  %v1000_v49 = vmul.f32 %v968_v43, %v210_v28  ;;  %v1006_v43 = vmul.f32 %v970_v44, %v242_v45  ;;  %v1012_v6 = vmul.f32 %v970_v44, %v246_v52 }
  0x87   :  { %v131_v60 = vadd.f32 %v123_v29, %v97_v33  ;;  %v132_v61 = vadd.f32 %v124_v30, %v98_v34  ;;  %v135_v62 = vadd.f32 %v127_v31, %v101_v35  ;;  %v136_v63 = vadd.f32 %v128_v32, %v102_v36  ;;  %v208_v30 = vld [vmem:[#allocation2 + $0x98] sm:$0xff]  ;;  %v211_v31 = vld [vmem:[#allocation2 + $0x1b0] sm:$0xff]  ;;  %v308_v33 = vld [vmem:[#allocation2 + $0xe8] sm:$0xff] }
  0x88   :  { %v167_v44 = vadd.f32 %v978_v2, %v133_v41  ;;  %v212_v32 = vld [vmem:[#allocation2 + $0x1b8] sm:$0xff]  ;;  %v312_v34 = vld [vmem:[#allocation2 + $0x208] sm:$0xff]  ;;  %v1030_v52 = vmul.f32 %v972_v47, %v308_v33  ;;  %v243_v41 = vld [vmem:[#allocation2 + $0x1c0] sm:$0xff] }
  0x89   :  { %v165_v26 = vadd.f32 %v157_v37, %v131_v60  ;;  %v166_v27 = vadd.f32 %v158_v38, %v132_v61  ;;  %v169_v28 = vadd.f32 %v161_v39, %v135_v62  ;;  %v170_v29 = vadd.f32 %v162_v40, %v136_v63  ;;  %v244_v60 = vld [vmem:[#allocation2 + $0x1c8] sm:$0xff]  ;;  %v275_v62 = vld [vmem:[#allocation2 + $0xd0] sm:$0xff]  ;;  %v276_v63 = vld [vmem:[#allocation2 + $0xd8] sm:$0xff] }
  0x8a   :  { %v982_v16 = vpop.permute.xlu2 %356  ;;  %v1036_v54 = vmul.f32 %v972_v47, %v312_v34 }
  0x8b   :  { %v984_v17 = vpop.permute.xlu1 %186  ;;  %v182_v25 = vpop.permute.xlu0 %181 }
  0x8c   :  { %v189_v13 = vmul.f32 %v182_v25, %v171_v53  ;;  %v190_v14 = vmul.f32 %v182_v25, %v172_v57  ;;  %v193_v15 = vmul.f32 %v182_v25, %v175_v58  ;;  %v194_v18 = vmul.f32 %v182_v25, %v176_v59  ;;  %v311_v25 = vld [vmem:[#allocation2 + $0x200] sm:$0xff] }
  0x8d   :  { %v191_v35 = vmul.f32 %v984_v17, %v173_v7  ;;  %v192_v0 = vmul.f32 %v984_v17, %v174_v10  ;;  %v195_v1 = vmul.f32 %v984_v17, %v177_v11  ;;  %v196_v2 = vmul.f32 %v984_v17, %v178_v12  ;;  %v239_v17 = vld [vmem:[#allocation2 + $0xa0] sm:$0xff] }
  0x8e   :  { %v197_v3 = vadd.f32 %v189_v13, %v163_v21  ;;  %v198_v36 = vadd.f32 %v190_v14, %v164_v22  ;;  %v201_v37 = vadd.f32 %v193_v15, %v167_v44  ;;  %v202_v38 = vadd.f32 %v194_v18, %v168_v23  ;;  %v279_v13 = vld [vmem:[#allocation2 + $0x1f0] sm:$0xff]  ;;  %v280_v14 = vld [vmem:[#allocation2 + $0x1f8] sm:$0xff]  ;;  %v273_v15 = vld [vmem:[#allocation2 + $0xc0] sm:$0xff] }
  0x8f   :  { %v1033_v53 = vmul.f32 %v972_v47, %v311_v25  ;;  %v199_v56 = vadd.f32 %v191_v35, %v165_v26  ;;  %v200_v57 = vadd.f32 %v192_v0, %v166_v27  ;;  %v203_v58 = vadd.f32 %v195_v1, %v169_v28  ;;  %v274_v44 = vld [vmem:[#allocation2 + $0xc8] sm:$0xff]  ;;  %v277_v23 = vld [vmem:[#allocation2 + $0x1e0] sm:$0xff] }
  0x90   :  { %v204_v59 = vadd.f32 %v196_v2, %v170_v29  ;;  %v231_v10 = vadd.f32 %v991_v46, %v197_v3  ;;  %v232_v11 = vadd.f32 %v994_v50, %v198_v36  ;;  %v235_v47 = vadd.f32 %v997_v48, %v201_v37  ;;  %v341_v1 = vld [vmem:[#allocation2 + $0x100] sm:$0xff]  ;;  %v309_v2 = vld [vmem:[#allocation2 + $0xf0] sm:$0xff] }
  0x91   :  { %v236_v12 = vadd.f32 %v1000_v49, %v202_v38  ;;  %v310_v38 = vld [vmem:[#allocation2 + $0xf8] sm:$0xff] }
  0x92   :  { %v1014_v8 = vpop.permute.xlu2 %407 }
  0x93   :  { %v1016_v9 = vpop.permute.xlu1 %249  ;;  %v221_v19 = vpop.permute.xlu0 %220 }
  0x94   :  { %v225_v39 = vmul.f32 %v221_v19, %v207_v24  ;;  %v226_v40 = vmul.f32 %v221_v19, %v208_v30  ;;  %v229_v42 = vmul.f32 %v221_v19, %v211_v31  ;;  %v230_v45 = vmul.f32 %v221_v19, %v212_v32  ;;  %v278_v24 = vld [vmem:[#allocation2 + $0x1e8] sm:$0xff] }
  0x95   :  { %v257_v26 = vmul.f32 %v1016_v9, %v239_v17  ;;  %v258_v46 = vmul.f32 %v1016_v9, %v240_v55  ;;  %v261_v50 = vmul.f32 %v1016_v9, %v243_v41  ;;  %v262_v48 = vmul.f32 %v1016_v9, %v244_v60  ;;  %v345_v41 = vld [vmem:[#allocation2 + $0x220] sm:$0xff] }
  0x96   :  { %v233_v19 = vadd.f32 %v225_v39, %v199_v56  ;;  %v234_v20 = vadd.f32 %v226_v40, %v200_v57  ;;  %v237_v21 = vadd.f32 %v229_v42, %v203_v58  ;;  %v238_v22 = vadd.f32 %v230_v45, %v204_v59  ;;  %v313_v39 = vld [vmem:[#allocation2 + $0x210] sm:$0xff]  ;;  %v314_v40 = vld [vmem:[#allocation2 + $0x218] sm:$0xff] }
  0x97   :  { %v265_v3 = vadd.f32 %v257_v26, %v231_v10  ;;  %v266_v9 = vadd.f32 %v258_v46, %v232_v11  ;;  %v269_v36 = vadd.f32 %v261_v50, %v235_v47  ;;  %v270_v37 = vadd.f32 %v262_v48, %v236_v12  ;;  %v348_v10 = vld [vmem:[#allocation2 + $0x238] sm:$0xff] }
  0x98   :  { %v267_v25 = vadd.f32 %v1003_v4, %v233_v19  ;;  %v268_v34 = vadd.f32 %v1006_v43, %v234_v20  ;;  %v271_v35 = vadd.f32 %v1009_v5, %v237_v21  ;;  %v272_v0 = vadd.f32 %v1012_v6, %v238_v22  ;;  %v342_v43 = vld [vmem:[#allocation2 + $0x108] sm:$0xff]  ;;  %v343_v6 = vld [vmem:[#allocation2 + $0x110] sm:$0xff] }
  0x99   :  { %v346_v5 = vld [vmem:[#allocation2 + $0x228] sm:$0xff]  ;;  %v366_v46 = vmul.f32 %v982_v16, %v348_v10 }
  0x9a   :  { %v1038_v61 = vpop.permute.xlu2 %454 }
  0x9b   :  { %v289_v7 = vpop.permute.xlu1 %288  ;;  %v284_v18 = vpop.permute.xlu0 %283 }
  0x9c   :  { %v293_v49 = vmul.f32 %v289_v7, %v275_v62  ;;  %v294_v27 = vmul.f32 %v289_v7, %v276_v63  ;;  %v297_v28 = vmul.f32 %v289_v7, %v279_v13  ;;  %v298_v29 = vmul.f32 %v289_v7, %v280_v14  ;;  %v344_v63 = vld [vmem:[#allocation2 + $0x118] sm:$0xff]  ;;  %v347_v7 = vld [vmem:[#allocation2 + $0x230] sm:$0xff] }
  0x9d   :  { %v291_v30 = vmul.f32 %v284_v18, %v273_v15  ;;  %v292_v31 = vmul.f32 %v284_v18, %v274_v44  ;;  %v295_v32 = vmul.f32 %v284_v18, %v277_v23  ;;  %v296_v33 = vmul.f32 %v284_v18, %v278_v24 }
  0x9e   :  { %v301_v42 = vadd.f32 %v293_v49, %v267_v25  ;;  %v302_v45 = vadd.f32 %v294_v27, %v268_v34  ;;  %v305_v17 = vadd.f32 %v297_v28, %v271_v35  ;;  %v306_v55 = vadd.f32 %v298_v29, %v272_v0 }
  0x9f   :  { %v299_v57 = vadd.f32 %v291_v30, %v265_v3  ;;  %v300_v58 = vadd.f32 %v292_v31, %v266_v9  ;;  %v303_v59 = vadd.f32 %v295_v32, %v269_v36  ;;  %v304_v60 = vadd.f32 %v296_v33, %v270_v37 }
  0xa0   :  { %v361_v23 = vmul.f32 %v982_v16, %v343_v6  ;;  %v362_v24 = vmul.f32 %v982_v16, %v344_v63  ;;  %v365_v26 = vmul.f32 %v982_v16, %v347_v7 }
  0xa1   :  { %v333_v50 = vadd.f32 %v1027_v51, %v299_v57  ;;  %v334_v48 = vadd.f32 %v1030_v52, %v300_v58  ;;  %v337_v49 = vadd.f32 %v1033_v53, %v303_v59  ;;  %v338_v27 = vadd.f32 %v1036_v54, %v304_v60 }
  0xa2   :  { %v1052_v4 = vpop.permute.xlu2 %502 }
  0xa3   :  { %v352_v56 = vpop.permute.xlu1 %351  ;;  %v323_v62 = vpop.permute.xlu0 %322 }
  0xa4   :  { %v327_v11 = vmul.f32 %v323_v62, %v309_v2  ;;  %v328_v47 = vmul.f32 %v323_v62, %v310_v38  ;;  %v331_v12 = vmul.f32 %v323_v62, %v313_v39  ;;  %v332_v13 = vmul.f32 %v323_v62, %v314_v40 }
  0xa5   :  { %v359_v14 = vmul.f32 %v352_v56, %v341_v1  ;;  %v360_v15 = vmul.f32 %v352_v56, %v342_v43  ;;  %v363_v18 = vmul.f32 %v352_v56, %v345_v41  ;;  %v364_v19 = vmul.f32 %v352_v56, %v346_v5 }
  0xa6   :  { %v335_v20 = vadd.f32 %v327_v11, %v301_v42  ;;  %v336_v21 = vadd.f32 %v328_v47, %v302_v45  ;;  %v339_v22 = vadd.f32 %v331_v12, %v305_v17  ;;  %v340_v44 = vadd.f32 %v332_v13, %v306_v55 }
  0xa7   :  { %v367_v25 = vadd.f32 %v359_v14, %v333_v50  ;;  %v368_v34 = vadd.f32 %v360_v15, %v334_v48  ;;  %v371_v35 = vadd.f32 %v363_v18, %v337_v49  ;;  %v372_v0 = vadd.f32 %v364_v19, %v338_v27 }
  0xa8   :  { %v369_v28 = vadd.f32 %v361_v23, %v335_v20  ;;  %v370_v29 = vadd.f32 %v362_v24, %v336_v21  ;;  %v373_v30 = vadd.f32 %v365_v26, %v339_v22  ;;  %v374_v31 = vadd.f32 %v366_v46, %v340_v44 }
  0xaa   :  { %v1062_v32 = vpop.permute.xlu2 %549 }
  0xab   :  { %v383_v33 = vpop.permute.xlu1 %382  ;;  %v378_v52 = vpop.permute.xlu0 %377 }
  0xac   :  { %v387_v16 = vadd.f32 %v383_v33, %v369_v28  ;;  %v388_v1 = vadd.f32 %v383_v33, %v370_v29  ;;  %v391_v51 = vadd.f32 %v383_v33, %v373_v30  ;;  %v392_v2 = vadd.f32 %v383_v33, %v374_v31 }
  0xad   :  { %v385_v3 = vadd.f32 %v378_v52, %v367_v25  ;;  %v386_v53 = vadd.f32 %v378_v52, %v368_v34  ;;  %v389_v9 = vadd.f32 %v378_v52, %v371_v35  ;;  %v390_v54 = vadd.f32 %v378_v52, %v372_v0 }
  0xae   :  { %v1064_v36 = vmax.f32 %v387_v16, 0.0  ;;  %v1066_v37 = vmax.f32 %v388_v1, 0.0  ;;  %v1068_v38 = vmax.f32 %v391_v51, 0.0  ;;  %v1070_v39 = vmax.f32 %v392_v2, 0.0 }
  0xaf   :  { %v1072_v40 = vmax.f32 %v385_v3, 0.0  ;;  %v1074_v42 = vmax.f32 %v386_v53, 0.0  ;;  %v1076_v45 = vmax.f32 %v389_v9, 0.0  ;;  %v1078_v17 = vmax.f32 %v390_v54, 0.0 }
  0xb0   :  { %v645_v56 = vperm.slane %v1064_v36, 4  ;;  %v646_v6 = vperm.slane %v1066_v37, 4  ;;  %v647_v57 = vperm.slane %v1068_v38, 4  ;;  %v648_v58 = vperm.slane %v1070_v39, 4 }
  0xb1   :  { %v401_v55 = vperm.slane %v1072_v40, 0  ;;  %v402_v43 = vperm.slane %v1074_v42, 0  ;;  %v403_v41 = vperm.slane %v1076_v45, 0  ;;  %v404_v5 = vperm.slane %v1078_v17, 0 }
  0xb2   :  { %v431_v60 = vperm.slane %v1072_v40, 2  ;;  %v432_v62 = vperm.slane %v1074_v42, 2  ;;  %v433_v63 = vperm.slane %v1076_v45, 2  ;;  %v434_v7 = vperm.slane %v1078_v17, 2  ;;  %v652_v11 = vpop.permute.xlu2 %651 }
  0xb3   :  { %v438_v59 = vpop.permute.xlu1 %437  ;;  %v421_v10 = vpop.permute.xlu0 %420  ;;  %v414_v47 = vperm.slane %v1072_v40, 1  ;;  %v415_v12 = vperm.slane %v1074_v42, 1  ;;  %v416_v13 = vperm.slane %v1076_v45, 1  ;;  %v417_v14 = vperm.slane %v1078_v17, 1 }
  0xb4   :  { %v410_v15 = vmul.f32 %v1014_v8, %v401_v55  ;;  %v411_v18 = vmul.f32 %v1014_v8, %v402_v43  ;;  %v412_v19 = vmul.f32 %v1014_v8, %v403_v41  ;;  %v413_v20 = vmul.f32 %v1014_v8, %v404_v5 }
  0xb5   :  { %v423_v21 = vmul.f32 %v421_v10, %v414_v47  ;;  %v424_v22 = vmul.f32 %v421_v10, %v415_v12  ;;  %v425_v44 = vmul.f32 %v421_v10, %v416_v13  ;;  %v426_v23 = vmul.f32 %v421_v10, %v417_v14 }
  0xb6   :  { %v1100_v24 = vmul.f32 %v652_v11, %v645_v56  ;;  %v1102_v26 = vmul.f32 %v652_v11, %v646_v6  ;;  %v1104_v46 = vmul.f32 %v652_v11, %v647_v57  ;;  %v1106_v50 = vmul.f32 %v652_v11, %v648_v58 }
  0xb7   :  { %v427_v48 = vadd.f32 %v423_v21, %v410_v15  ;;  %v428_v49 = vadd.f32 %v424_v22, %v411_v18  ;;  %v429_v27 = vadd.f32 %v425_v44, %v412_v19  ;;  %v430_v28 = vadd.f32 %v426_v23, %v413_v20 }
  0xb8   :  { %v483_v29 = vperm.slane %v1072_v40, 4  ;;  %v484_v8 = vperm.slane %v1074_v42, 4  ;;  %v485_v30 = vperm.slane %v1076_v45, 4  ;;  %v486_v31 = vperm.slane %v1078_v17, 4 }
  0xb9   :  { %v496_v25 = vperm.slane %v1072_v40, 5  ;;  %v497_v34 = vperm.slane %v1074_v42, 5  ;;  %v498_v35 = vperm.slane %v1076_v45, 5  ;;  %v499_v0 = vperm.slane %v1078_v17, 5 }
  0xba   :  { %v440_v16 = vmul.f32 %v438_v59, %v431_v60  ;;  %v441_v1 = vmul.f32 %v438_v59, %v432_v62  ;;  %v442_v51 = vmul.f32 %v438_v59, %v433_v63  ;;  %v443_v2 = vmul.f32 %v438_v59, %v434_v7 }
  0xbb   :  { %v490_v33 = vpop.permute.xlu1 %489  ;;  %v468_v52 = vpop.permute.xlu0 %467  ;;  %v505_v55 = vmul.f32 %v1052_v4, %v496_v25  ;;  %v506_v43 = vmul.f32 %v1052_v4, %v497_v34  ;;  %v507_v41 = vmul.f32 %v1052_v4, %v498_v35  ;;  %v508_v5 = vmul.f32 %v1052_v4, %v499_v0 }
  0xbc   :  { %v492_v3 = vmul.f32 %v490_v33, %v483_v29  ;;  %v493_v53 = vmul.f32 %v490_v33, %v484_v8  ;;  %v494_v9 = vmul.f32 %v490_v33, %v485_v30  ;;  %v495_v54 = vmul.f32 %v490_v33, %v486_v31 }
  0xbd   :  { %v444_v56 = vadd.f32 %v440_v16, %v427_v48  ;;  %v445_v6 = vadd.f32 %v441_v1, %v428_v49  ;;  %v446_v57 = vadd.f32 %v442_v51, %v429_v27  ;;  %v447_v58 = vadd.f32 %v443_v2, %v430_v28 }
  0xbe   :  { %v509_v60 = vadd.f32 %v505_v55, %v492_v3  ;;  %v510_v62 = vadd.f32 %v506_v43, %v493_v53  ;;  %v511_v59 = vadd.f32 %v507_v41, %v494_v9  ;;  %v512_v63 = vadd.f32 %v508_v5, %v495_v54 }
  0xbf   :  { %v448_v7 = vperm.slane %v1072_v40, 3  ;;  %v449_v10 = vperm.slane %v1074_v42, 3  ;;  %v450_v11 = vperm.slane %v1076_v45, 3  ;;  %v451_v47 = vperm.slane %v1078_v17, 3 }
  0xc0   :  { %v530_v12 = vperm.slane %v1072_v40, 7  ;;  %v531_v4 = vperm.slane %v1074_v42, 7  ;;  %v532_v13 = vperm.slane %v1076_v45, 7  ;;  %v533_v14 = vperm.slane %v1078_v17, 7 }
  0xc1   :  { %v457_v15 = vmul.f32 %v1038_v61, %v448_v7  ;;  %v458_v18 = vmul.f32 %v1038_v61, %v449_v10  ;;  %v459_v19 = vmul.f32 %v1038_v61, %v450_v11  ;;  %v460_v20 = vmul.f32 %v1038_v61, %v451_v47 }
  0xc2   :  { %v513_v30 = vperm.slane %v1072_v40, 6  ;;  %v514_v31 = vperm.slane %v1074_v42, 6  ;;  %v515_v33 = vperm.slane %v1076_v45, 6  ;;  %v516_v25 = vperm.slane %v1078_v17, 6 }
  0xc3   :  { %v537_v21 = vpop.permute.xlu1 %536  ;;  %v520_v49 = vpop.permute.xlu0 %519  ;;  %v461_v27 = vadd.f32 %v457_v15, %v444_v56  ;;  %v462_v28 = vadd.f32 %v458_v18, %v445_v6  ;;  %v463_v29 = vadd.f32 %v459_v19, %v446_v57  ;;  %v464_v8 = vadd.f32 %v460_v20, %v447_v58 }
  0xc4   :  { %v539_v22 = vmul.f32 %v537_v21, %v530_v12  ;;  %v540_v44 = vmul.f32 %v537_v21, %v531_v4  ;;  %v541_v23 = vmul.f32 %v537_v21, %v532_v13  ;;  %v542_v48 = vmul.f32 %v537_v21, %v533_v14 }
  0xc5   :  { %v470_v34 = vadd.f32 %v468_v52, %v461_v27  ;;  %v471_v61 = vadd.f32 %v468_v52, %v462_v28  ;;  %v472_v35 = vadd.f32 %v468_v52, %v463_v29  ;;  %v473_v0 = vadd.f32 %v468_v52, %v464_v8 }
  0xc6   :  { %v522_v16 = vmul.f32 %v520_v49, %v513_v30  ;;  %v523_v1 = vmul.f32 %v520_v49, %v514_v31  ;;  %v524_v51 = vmul.f32 %v520_v49, %v515_v33  ;;  %v525_v2 = vmul.f32 %v520_v49, %v516_v25 }
  0xc7   :  { %v474_v3 = vmax.f32 %v470_v34, 0.0  ;;  %v475_v53 = vmax.f32 %v471_v61, 0.0  ;;  %v476_v9 = vmax.f32 %v472_v35, 0.0  ;;  %v477_v54 = vmax.f32 %v473_v0, 0.0 }
  0xc8   :  { %v526_v55 = vadd.f32 %v522_v16, %v509_v60  ;;  %v527_v40 = vadd.f32 %v523_v1, %v510_v62  ;;  %v528_v43 = vadd.f32 %v524_v51, %v511_v59  ;;  %v529_v42 = vadd.f32 %v525_v2, %v512_v63 }
  0xc9   :  { %v675_v45 = vperm.slane %v1064_v36, 6  ;;  %v676_v17 = vperm.slane %v1066_v37, 6  ;;  %v677_v41 = vperm.slane %v1068_v38, 6  ;;  %v678_v52 = vperm.slane %v1070_v39, 6  ;;  %478 = vst [vmem:[#allocation5] sm:$0xff] %v474_v3 }
  0xca   :  { %480 = vst.msk [vmem:[#allocation5 + $0x8] sm:$0xff] %vm479_vm0, %v475_v53  ;;  %v543_v56 = vadd.f32 %v539_v22, %v526_v55  ;;  %v544_v6 = vadd.f32 %v540_v44, %v527_v40  ;;  %v545_v57 = vadd.f32 %v541_v23, %v528_v43  ;;  %v546_v58 = vadd.f32 %v542_v48, %v529_v42  ;;  %v682_v22 = vpop.permute.xlu2 %681 }
  0xcb   :  { %v584_v5 = vpop.permute.xlu1 %583  ;;  %v571_v60 = vpop.permute.xlu0 %570  ;;  %481 = vst [vmem:[#allocation5 + $0x40] sm:$0xff] %v476_v9  ;;  %v577_v62 = vperm.slane %v1064_v36, 1  ;;  %v578_v59 = vperm.slane %v1066_v37, 1  ;;  %v579_v63 = vperm.slane %v1068_v38, 1  ;;  %v580_v7 = vperm.slane %v1070_v39, 1 }
  0xcc   :  { %482 = vst.msk [vmem:[#allocation5 + $0x48] sm:$0xff] %vm479_vm0, %v477_v54  ;;  %v552_v10 = vadd.f32 %v1062_v32, %v543_v56  ;;  %v553_v11 = vadd.f32 %v1062_v32, %v544_v6  ;;  %v554_v47 = vadd.f32 %v1062_v32, %v545_v57  ;;  %v555_v12 = vadd.f32 %v1062_v32, %v546_v58 }
  0xcd   :  { %v586_v4 = vmul.f32 %v584_v5, %v577_v62  ;;  %v564_v13 = vperm.slane %v1064_v36, 0  ;;  %v565_v14 = vperm.slane %v1066_v37, 0  ;;  %v566_v15 = vperm.slane %v1068_v38, 0 }
  0xce   :  { %v556_v18 = vmax.f32 %v552_v10, 0.0  ;;  %v557_v19 = vmax.f32 %v553_v11, 0.0  ;;  %v558_v20 = vmax.f32 %v554_v47, 0.0  ;;  %v567_v21 = vperm.slane %v1070_v39, 0 }
  0xcf   :  { %v559_v44 = vmax.f32 %v555_v12, 0.0  ;;  %v587_v23 = vmul.f32 %v584_v5, %v578_v59  ;;  %v588_v48 = vmul.f32 %v584_v5, %v579_v63  ;;  %v589_v49 = vmul.f32 %v584_v5, %v580_v7 }
  0xd0   :  { %560 = vst [vmem:[#allocation5 + $0x10] sm:$0xff] %v556_v18  ;;  %v573_v27 = vmul.f32 %v571_v60, %v564_v13  ;;  %v574_v32 = vmul.f32 %v571_v60, %v565_v14  ;;  %v575_v28 = vmul.f32 %v571_v60, %v566_v15  ;;  %v576_v29 = vmul.f32 %v571_v60, %v567_v21 }
  0xd1   :  { %561 = vst.msk [vmem:[#allocation5 + $0x18] sm:$0xff] %vm479_vm0, %v557_v19  ;;  %v594_v30 = vperm.slane %v1064_v36, 2  ;;  %v595_v31 = vperm.slane %v1066_v37, 2  ;;  %v596_v33 = vperm.slane %v1068_v38, 2  ;;  %v597_v25 = vperm.slane %v1070_v39, 2 }
  0xd2   :  { %v684_v34 = vmul.f32 %v682_v22, %v675_v45  ;;  %v685_v61 = vmul.f32 %v682_v22, %v676_v17  ;;  %v686_v35 = vmul.f32 %v682_v22, %v677_v41  ;;  %v687_v0 = vmul.f32 %v682_v22, %v678_v52  ;;  %562 = vst [vmem:[#allocation5 + $0x50] sm:$0xff] %v558_v20 }
  0xd3   :  { %v601_v8 = vpop.permute.xlu1 %600  ;;  %v665_v16 = vpop.permute.xlu0 %664  ;;  %563 = vst.msk [vmem:[#allocation5 + $0x58] sm:$0xff] %vm479_vm0, %v559_v44  ;;  %v658_v53 = vperm.slane %v1064_v36, 5  ;;  %v659_v9 = vperm.slane %v1066_v37, 5  ;;  %v660_v54 = vperm.slane %v1068_v38, 5  ;;  %v661_v55 = vperm.slane %v1070_v39, 5 }
  0xd4   :  { %v603_v1 = vmul.f32 %v601_v8, %v594_v30  ;;  %v604_v51 = vmul.f32 %v601_v8, %v595_v31  ;;  %v605_v2 = vmul.f32 %v601_v8, %v596_v33  ;;  %v606_v3 = vmul.f32 %v601_v8, %v597_v25 }
  0xd5   :  { %v590_v40 = vadd.f32 %v586_v4, %v573_v27  ;;  %v591_v43 = vadd.f32 %v587_v23, %v574_v32  ;;  %v592_v42 = vadd.f32 %v588_v48, %v575_v28  ;;  %v593_v45 = vadd.f32 %v589_v49, %v576_v29 }
  0xd6   :  { %v667_v17 = vmul.f32 %v665_v16, %v658_v53  ;;  %v668_v41 = vmul.f32 %v665_v16, %v659_v9  ;;  %v669_v52 = vmul.f32 %v665_v16, %v660_v54  ;;  %v670_v5 = vmul.f32 %v665_v16, %v661_v55 }
  0xd7   :  { %v607_v56 = vadd.f32 %v603_v1, %v590_v40  ;;  %v608_v6 = vadd.f32 %v604_v51, %v591_v43  ;;  %v609_v57 = vadd.f32 %v605_v2, %v592_v42  ;;  %v610_v58 = vadd.f32 %v606_v3, %v593_v45 }
  0xd8   :  { %v692_v60 = vperm.slane %v1064_v36, 7  ;;  %v693_v62 = vperm.slane %v1066_v37, 7  ;;  %v694_v59 = vperm.slane %v1068_v38, 7  ;;  %v695_v63 = vperm.slane %v1070_v39, 7 }
  0xd9   :  { %v611_v10 = vperm.slane %v1064_v36, 3  ;;  %v612_v11 = vperm.slane %v1066_v37, 3  ;;  %v613_v47 = vperm.slane %v1068_v38, 3  ;;  %v614_v12 = vperm.slane %v1070_v39, 3 }
  0xda   :  { %v671_v4 = vadd.f32 %v667_v17, %v1100_v24  ;;  %v672_v13 = vadd.f32 %v668_v41, %v1102_v26  ;;  %v673_v14 = vadd.f32 %v669_v52, %v1104_v46  ;;  %v674_v15 = vadd.f32 %v670_v5, %v1106_v50  ;;  %v631_v24 = vpop.permute.xlu2 %630 }
  0xdb   :  { %v699_v7 = vpop.permute.xlu1 %698  ;;  %v618_v18 = vpop.permute.xlu0 %617 }
  0xdc   :  { %v620_v19 = vmul.f32 %v618_v18, %v611_v10  ;;  %v621_v20 = vmul.f32 %v618_v18, %v612_v11  ;;  %v622_v21 = vmul.f32 %v618_v18, %v613_v47  ;;  %v623_v22 = vmul.f32 %v618_v18, %v614_v12 }
  0xdd   :  { %v701_v36 = vmul.f32 %v699_v7, %v692_v60  ;;  %v702_v44 = vmul.f32 %v699_v7, %v693_v62  ;;  %v703_v37 = vmul.f32 %v699_v7, %v694_v59  ;;  %v704_v23 = vmul.f32 %v699_v7, %v695_v63 }
  0xde   :  { %v624_v38 = vadd.f32 %v620_v19, %v607_v56  ;;  %v625_v48 = vadd.f32 %v621_v20, %v608_v6  ;;  %v626_v39 = vadd.f32 %v622_v21, %v609_v57  ;;  %v627_v49 = vadd.f32 %v623_v22, %v610_v58 }
  0xdf   :  { %v688_v27 = vadd.f32 %v684_v34, %v671_v4  ;;  %v689_v26 = vadd.f32 %v685_v61, %v672_v13  ;;  %v690_v32 = vadd.f32 %v686_v35, %v673_v14  ;;  %v691_v46 = vadd.f32 %v687_v0, %v674_v15 }
  0xe0   :  { %v633_v28 = vadd.f32 %v631_v24, %v624_v38  ;;  %v634_v50 = vadd.f32 %v631_v24, %v625_v48  ;;  %v635_v29 = vadd.f32 %v631_v24, %v626_v39  ;;  %v636_v8 = vadd.f32 %v631_v24, %v627_v49 }
  0xe1   :  { %v705_v30 = vadd.f32 %v701_v36, %v688_v27  ;;  %v706_v31 = vadd.f32 %v702_v44, %v689_v26  ;;  %v707_v33 = vadd.f32 %v703_v37, %v690_v32  ;;  %v708_v51 = vadd.f32 %v704_v23, %v691_v46 }
  0xe2   :  { %v637_v25 = vmax.f32 %v633_v28, 0.0  ;;  %v638_v16 = vmax.f32 %v634_v50, 0.0  ;;  %v639_v1 = vmax.f32 %v635_v29, 0.0  ;;  %v640_v2 = vmax.f32 %v636_v8, 0.0 }
  0xe3   :  { %v712_v3 = vpop.permute.xlu0 %711 }
  0xe4   :  { %641 = vst [vmem:[#allocation5 + $0x20] sm:$0xff] %v637_v25  ;;  %v714_v53 = vadd.f32 %v712_v3, %v705_v30  ;;  %v715_v9 = vadd.f32 %v712_v3, %v706_v31  ;;  %v716_v34 = vadd.f32 %v712_v3, %v707_v33  ;;  %v717_v61 = vadd.f32 %v712_v3, %v708_v51 }
  0xe5   :  { %642 = vst.msk [vmem:[#allocation5 + $0x28] sm:$0xff] %vm479_vm0, %v638_v16 }
  0xe6   :  { %643 = vst [vmem:[#allocation5 + $0x60] sm:$0xff] %v639_v1  ;;  %v718_v35 = vmax.f32 %v714_v53, 0.0  ;;  %v719_v0 = vmax.f32 %v715_v9, 0.0  ;;  %v720_v54 = vmax.f32 %v716_v34, 0.0  ;;  %v721_v55 = vmax.f32 %v717_v61, 0.0 }
  0xe7   :  { %644 = vst.msk [vmem:[#allocation5 + $0x68] sm:$0xff] %vm479_vm0, %v640_v2 }
  0xe8   :  { %722 = vst [vmem:[#allocation5 + $0x30] sm:$0xff] %v718_v35 }
  0xe9   :  { %723 = vst.msk [vmem:[#allocation5 + $0x38] sm:$0xff] %vm479_vm0, %v719_v0 }
  0xea   :  { %724 = vst [vmem:[#allocation5 + $0x70] sm:$0xff] %v720_v54 }
  0xeb   :  { %725 = vst.msk [vmem:[#allocation5 + $0x78] sm:$0xff] %vm479_vm0, %v721_v55 }
  0xec   :  { %738 = dma.vmem_to_hbm [thread:$0]  %s731_s4, 2048, %s733_s30, [#allocation4], %s806_s23, %s806_s23, %s807_s24  }
  0xed   :  { %803 = dma.done.wait [#allocation4], 2048  }
  0xee   :  { %804 = vsyncadd [#allocation4], 4294965248 }
  0xef   :  { %743 = vsyncpa [#allocation3], 1 }
  0xf0   :  { %744 = vsyncpa [#allocation4], 1 }

</bundles_post_ra>
